<compile_context>
chip_gen: v7x
topology: tpu7x:2x2x1
jax: 0.10.0
libtpu: 0.0.40
codegen_flags: <defaults>
</compile_context>

<pallas_src>
import functools
import math

import jax
import jax.numpy as jnp
from jax.experimental import pallas as pl
from jax.experimental.pallas import tpu as pltpu


# ---------------------------------------------------------------------------
# Small helpers
# ---------------------------------------------------------------------------
def _ceil_to(x, m):
    return -(-x // m) * m


def _block_bytes(shape, dtype):
    """Bytes of one VMEM block, padded to the (8, 128) vreg tile."""
    itemsize = jnp.dtype(dtype).itemsize
    shape = (1,) * max(0, 2 - len(shape)) + tuple(shape)
    *lead, sl, ln = shape
    packing = max(1, 4 // itemsize)            # sub-32-bit dtypes pack sublanes
    n = _ceil_to(sl, 8 * packing) * _ceil_to(ln, 128)
    for d in lead:
        n *= d
    return n * itemsize


def _vmem_limit(block_bytes):
    """Scoped-VMEM limit sized from block arithmetic (+headroom), v7x-safe cap."""
    return int(min(max(block_bytes + (8 << 20), 16 << 20), 64 << 20))


def _const_spec(shape, single_buffer):
    """BlockSpec for a grid-invariant operand (weights / biases)."""
    idx = lambda *_: (0,) * len(shape)
    if single_buffer:
        # Constant index map -> one resident copy is enough; halves its VMEM.
        return pl.BlockSpec(shape, idx, pipeline_mode=pl.Buffered(1))
    return pl.BlockSpec(shape, idx)


# ---------------------------------------------------------------------------
# Stage 1: hoisted input projection.
#   ONE bf16 GEMM per row-block against the fused [E, 8H] weight computes both
#   directions' gate pre-activations (+ folded b_ih+b_hh); the lane-aligned 4H
#   halves go to separate fwd/bwd bf16 gate tensors.
# ---------------------------------------------------------------------------
def _in_proj_kernel(x_ref, w_ref, b_ref, gf_ref, gb_ref, *, gate_width):
    g = jnp.dot(x_ref[...], w_ref[...], preferred_element_type=jnp.float32)
    g = g + b_ref[...]
    gf_ref[...] = g[:, :gate_width].astype(gf_ref.dtype)   # lane-aligned split
    gb_ref[...] = g[:, gate_width:].astype(gb_ref.dtype)


def _input_projection(x2d, w_in, b_in, gate_width, single_buffer, tile_m=512):
    """x2d: [M, E] bf16; w_in: [E, 8H] bf16; b_in: [1, 8H] f32.
    Returns (G_f, G_b): [M, 4H] bf16."""
    M, E = x2d.shape
    G8 = w_in.shape[1]
    tile_m = min(tile_m, M)                    # 512-row tiles (HBM roofline)
    pad = (-M) % tile_m
    if pad:
        x2d = jnp.pad(x2d, ((0, pad), (0, 0)))
    Mp = M + pad

    blk = (2 * _block_bytes((tile_m, E), x2d.dtype)                 # x (2 bufs)
           + 2 * _block_bytes((E, G8), w_in.dtype)                  # weight
           + 2 * _block_bytes((1, G8), b_in.dtype)                  # bias
           + 2 * 2 * _block_bytes((tile_m, gate_width), jnp.bfloat16))

    kernel = functools.partial(_in_proj_kernel, gate_width=gate_width)
    gf, gb = pl.pallas_call(
        kernel,
        out_shape=(jax.ShapeDtypeStruct((Mp, gate_width), jnp.bfloat16),
                   jax.ShapeDtypeStruct((Mp, gate_width), jnp.bfloat16)),
        grid_spec=pltpu.PrefetchScalarGridSpec(
            num_scalar_prefetch=0,
            grid=(Mp // tile_m,),
            in_specs=[
                pl.BlockSpec((tile_m, E), lambda i: (i, 0)),
                _const_spec((E, G8), single_buffer),
                _const_spec((1, G8), single_buffer),
            ],
            out_specs=[
                pl.BlockSpec((tile_m, gate_width), lambda i: (i, 0)),
                pl.BlockSpec((tile_m, gate_width), lambda i: (i, 0)),
            ],
        ),
        compiler_params=pltpu.CompilerParams(
            dimension_semantics=("parallel",),
            vmem_limit_bytes=_vmem_limit(blk)),
    )(x2d, w_in, b_in)
    if pad:
        gf, gb = gf[:M], gb[:M]
    return gf, gb


# ---------------------------------------------------------------------------
# Stage 2: time-blocked bidirectional recurrence with fused Linear epilogue.
#   Grid step tb: forward direction consumes gate block tb (ascending time),
#   backward direction consumes gate block n_tb-1-tb traversed in reverse.
#   h (concatenated [fwd|bwd]) lives in VMEM scratch across grid steps; c is
#   carried in vregs inside each block and synced to scratch at block edges.
# ---------------------------------------------------------------------------
def _bilstm_kernel(gf_ref, gb_ref, whh_ref, wlf_ref, wlb_ref,
                   of_ref, ob_ref, h_ref, cf_ref, cb_ref,
                   *, hidden_size, t_block, fuse_whh):
    H, Tb = hidden_size, t_block
    tb = pl.program_id(0)

    @pl.when(tb == 0)
    def _():
        h_ref[...] = jnp.zeros_like(h_ref)
        cf_ref[...] = jnp.zeros_like(cf_ref)
        cb_ref[...] = jnp.zeros_like(cb_ref)

    whh = whh_ref[...]                       # bf16 recurrent weight(s)
    wlf = wlf_ref[...]                       # bf16 (H, O) fwd Linear weight
    wlb = wlb_ref[...]                       # bf16 (H, O) bwd Linear weight

    def gate_math(pre, c_prev):
        # PyTorch gate order [i, f, g, o].
        i = jax.nn.sigmoid(pre[:, 0 * H:1 * H])
        f = jax.nn.sigmoid(pre[:, 1 * H:2 * H])
        g = jnp.tanh(pre[:, 2 * H:3 * H])
        o = jax.nn.sigmoid(pre[:, 3 * H:4 * H])
        c_new = f * c_prev + i * g
        h_new = o * jnp.tanh(c_new)
        return h_new, c_new

    def step(s, carry):
        c_f, c_b = carry                     # cell state stays in vregs
        h_bf = h_ref[...].astype(jnp.bfloat16)          # (N, 2H) = [h_f | h_b]
        if fuse_whh:
            # Both directions' recurrent dots in one MXU pass (2H <= MXU K).
            rec = jnp.dot(h_bf, whh, preferred_element_type=jnp.float32)
            rec_f, rec_b = rec[:, :4 * H], rec[:, 4 * H:]
        else:
            # 2H > 128: block-diagonal zeros would waste MXU passes (v5e K=128)
            # -> two per-direction dots instead.
            rec_f = jnp.dot(h_bf[:, :H], whh[0],
                            preferred_element_type=jnp.float32)
            rec_b = jnp.dot(h_bf[:, H:], whh[1],
                            preferred_element_type=jnp.float32)
        pre_f = rec_f + gf_ref[s]
        pre_b = rec_b + gb_ref[Tb - 1 - s]
        hf_new, cf_new = gate_math(pre_f, c_f)
        hb_new, cb_new = gate_math(pre_b, c_b)
        # In-place half writes: no per-step concatenate on the serial path;
        # the next step's recurrent dot re-reads the contiguous h_ref.
        h_ref[:, :H] = hf_new
        h_ref[:, H:] = hb_new
        # Fused Linear epilogue, one small dot per direction (the [T, N, 2H]
        # recurrent tensor never leaves VMEM).  b_lin is folded into the XLA
        # epilogue, so nothing is broadcast inside the unrolled loop.
        of_ref[s] = jnp.dot(hf_new.astype(jnp.bfloat16), wlf,
                            preferred_element_type=jnp.float32)
        ob_ref[Tb - 1 - s] = jnp.dot(hb_new.astype(jnp.bfloat16), wlb,
                                     preferred_element_type=jnp.float32)
        return cf_new, cb_new

    c_f, c_b = jax.lax.fori_loop(0, Tb, step, (cf_ref[...], cb_ref[...]),
                                 unroll=True)
    cf_ref[...] = c_f
    cb_ref[...] = c_b


def _pick_time_block(T, cap=16):
    # Tb in {8,16}: amortizes the ~0.35 us per-grid-step overhead without
    # spilling the 64-entry vreg file when the inner loop is fully unrolled.
    tb = min(T, cap)
    while T % tb:
        tb -= 1
    return tb


def _bilstm_recurrence(g_f, g_b, whh, wlf, wlb, hidden_size, out_size,
                       single_buffer):
    T, N, _ = g_f.shape
    H, O = hidden_size, out_size
    Tb = _pick_time_block(T)
    n_tb = T // Tb
    fuse_whh = (whh.ndim == 2)

    blk = (2 * 2 * _block_bytes((Tb, N, 4 * H), g_f.dtype)      # gates (2 dirs)
           + 2 * _block_bytes(whh.shape, whh.dtype)
           + 2 * 2 * _block_bytes((H, O), wlf.dtype)
           + 2 * 2 * _block_bytes((Tb, N, O), jnp.float32)      # outputs
           + _block_bytes((N, 2 * H), jnp.float32)              # h scratch
           + 2 * _block_bytes((N, H), jnp.float32))             # c scratch

    kernel = functools.partial(_bilstm_kernel, hidden_size=H, t_block=Tb,
                               fuse_whh=fuse_whh)
    out_f, out_b = pl.pallas_call(
        kernel,
        out_shape=(jax.ShapeDtypeStruct((T, N, O), jnp.float32),
                   jax.ShapeDtypeStruct((T, N, O), jnp.float32)),
        grid_spec=pltpu.PrefetchScalarGridSpec(
            num_scalar_prefetch=0,
            grid=(n_tb,),
            in_specs=[
                pl.BlockSpec((Tb, N, 4 * H), lambda t: (t, 0, 0)),
                pl.BlockSpec((Tb, N, 4 * H), lambda t: (n_tb - 1 - t, 0, 0)),
                _const_spec(whh.shape, single_buffer),
                _const_spec((H, O), single_buffer),
                _const_spec((H, O), single_buffer),
            ],
            out_specs=[
                pl.BlockSpec((Tb, N, O), lambda t: (t, 0, 0)),
                pl.BlockSpec((Tb, N, O), lambda t: (n_tb - 1 - t, 0, 0)),
            ],
            scratch_shapes=[pltpu.VMEM((N, 2 * H), jnp.float32),   # h [fwd|bwd]
                            pltpu.VMEM((N, H), jnp.float32),       # c fwd
                            pltpu.VMEM((N, H), jnp.float32)],      # c bwd
        ),
        compiler_params=pltpu.CompilerParams(
            dimension_semantics=("arbitrary",),       # serial recurrence
            vmem_limit_bytes=_vmem_limit(blk)),
    )(g_f, g_b, whh, wlf, wlb)
    return out_f, out_b


# ---------------------------------------------------------------------------
# Module wrapper
# ---------------------------------------------------------------------------
def init_params(key, input_size, hidden_size, output_size):
    """Deterministic init mirroring PyTorch parameter shapes."""
    H, E, O = hidden_size, input_size, output_size
    k_lstm = 1.0 / math.sqrt(H)
    k_lin = 1.0 / math.sqrt(2 * H)
    keys = jax.random.split(key, 10)
    u = lambda k, shape, lim: jax.random.uniform(
        k, shape, jnp.float32, minval=-lim, maxval=lim)
    return {
        "w_ih_f": u(keys[0], (4 * H, E), k_lstm),
        "w_hh_f": u(keys[1], (4 * H, H), k_lstm),
        "b_ih_f": u(keys[2], (4 * H,), k_lstm),
        "b_hh_f": u(keys[3], (4 * H,), k_lstm),
        "w_ih_b": u(keys[4], (4 * H, E), k_lstm),
        "w_hh_b": u(keys[5], (4 * H, H), k_lstm),
        "b_ih_b": u(keys[6], (4 * H,), k_lstm),
        "b_hh_b": u(keys[7], (4 * H,), k_lstm),
        "w_lin": u(keys[8], (O, 2 * H), k_lin),
        "b_lin": u(keys[9], (O,), k_lin),
    }


def _forward_impl(x_nte, params, hidden_size, output_size, single_buffer):
    N, T, E = x_nte.shape
    H, O = hidden_size, output_size

    # ---- stage 1: fused bf16 input-projection GEMM (one pass over x) -------
    # The bf16 downcast is fused with the [N,T,E]->[T,N,E] transpose (one XLA
    # pass, half the write bytes).
    # TODO(synk): fold this transpose into stage 1's BlockSpec DMA (read
    # (N,Tb,E) blocks + in-VMEM swapaxes) to drop the standalone pass.
    x_tm = jnp.transpose(x_nte, (1, 0, 2)).astype(jnp.bfloat16)     # [T, N, E]
    x2d = x_tm.reshape(T * N, E)
    w_in = jnp.concatenate([params["w_ih_f"].T, params["w_ih_b"].T],
                           axis=1).astype(jnp.bfloat16)             # [E, 8H]
    b_in = jnp.concatenate([params["b_ih_f"] + params["b_hh_f"],
                            params["b_ih_b"] + params["b_hh_b"]]
                           ).reshape(1, 8 * H)                      # f32
    gf2d, gb2d = _input_projection(x2d, w_in, b_in, 4 * H, single_buffer)
    g_f = gf2d.reshape(T, N, 4 * H)
    g_b = gb2d.reshape(T, N, 4 * H)

    # ---- recurrent / output-projection weights ------------------------------
    # Fuse the two directions' W_hh into one block-diagonal dot only while it
    # is free on the MXU (2H <= 128 K lanes; on v6e/v7x the K pad is 256 so
    # the threshold could be raised to 256).
    if 2 * H <= 128:
        whh = jnp.zeros((2 * H, 8 * H), jnp.float32)
        whh = whh.at[:H, :4 * H].set(params["w_hh_f"].T)
        whh = whh.at[H:, 4 * H:].set(params["w_hh_b"].T)
    else:
        whh = jnp.stack([params["w_hh_f"].T, params["w_hh_b"].T])   # (2, H, 4H)
    whh = whh.astype(jnp.bfloat16)
    w_lin_t = params["w_lin"].T                                     # (2H, O)
    wlf = w_lin_t[:H].astype(jnp.bfloat16)
    wlb = w_lin_t[H:].astype(jnp.bfloat16)

    # ---- stage 2: recurrence with fused per-direction Linear epilogue ------
    out_f, out_b = _bilstm_recurrence(g_f, g_b, whh, wlf, wlb, H, O,
                                      single_buffer)

    # fwd+bwd sum, Linear bias and the [T,N,O]->[N,T,O] transpose: one fused
    # XLA pass over the smallest tensor in the pipeline.
    return jnp.transpose(out_f + out_b, (1, 0, 2)) + params["b_lin"]


def bidirectional_lstm_forward(x_nte, params, hidden_size, output_size):
    """x_nte: [N, T, E] (batch_first). Returns [N, T, output_size] (f32)."""
    try:
        return _forward_impl(x_nte, params, hidden_size, output_size, True)
    except Exception:
        # Fallback if pl.Buffered(1) single-buffering of constant weights is
        # not supported by this jax/libtpu; everything else is unchanged.
        return _forward_impl(x_nte, params, hidden_size, output_size, False)


# ---------------------------------------------------------------------------
# Pure-JAX reference (mirrors PyTorch semantics) for verification.
# ---------------------------------------------------------------------------
def _lstm_dir_ref(x_nte, wih, whh, bih, bhh, reverse):
    N, T, E = x_nte.shape
    H = whh.shape[1]

    def cell(carry, xt):
        h, c = carry
        gates = xt @ wih.T + bih + h @ whh.T + bhh
        i, f, g, o = jnp.split(gates, 4, axis=-1)
        c = jax.nn.sigmoid(f) * c + jax.nn.sigmoid(i) * jnp.tanh(g)
        h = jax.nn.sigmoid(o) * jnp.tanh(c)
        return (h, c), h

    xs = jnp.swapaxes(x_nte, 0, 1)
    if reverse:
        xs = xs[::-1]
    _, hs = jax.lax.scan(cell, (jnp.zeros((N, H)), jnp.zeros((N, H))), xs)
    if reverse:
        hs = hs[::-1]
    return jnp.swapaxes(hs, 0, 1)


def reference_forward(x_nte, params):
    hf = _lstm_dir_ref(x_nte, params["w_ih_f"], params["w_hh_f"],
                       params["b_ih_f"], params["b_hh_f"], reverse=False)
    hb = _lstm_dir_ref(x_nte, params["w_ih_b"], params["w_hh_b"],
                       params["b_ih_b"], params["b_hh_b"], reverse=True)
    rec = jnp.concatenate([hf, hb], axis=-1)
    return rec @ params["w_lin"].T + params["b_lin"]


if __name__ == "__main__":
    N, T, E, H, O = 2, 8, 32, 32, 16

    key = jax.random.PRNGKey(0)
    kx, kp = jax.random.split(key)
    x = jax.random.normal(kx, (N, T, E), jnp.float32)
    params = init_params(kp, E, H, O)

    out = jax.block_until_ready(bidirectional_lstm_forward(x, params, H, O))
    ref = jax.block_until_ready(reference_forward(x, params))

    assert out.shape == (N, T, O), out.shape
    # bf16 MXU inputs / bf16 inter-stage gates (f32 accumulation and f32 h/c
    # state): tolerance loosened accordingly vs the f32 reference.
    assert jnp.allclose(out, ref, atol=5e-2, rtol=5e-2), \
        float(jnp.max(jnp.abs(out - ref)))

    print("KERNEL_OK")
</pallas_src>

<mosaic_0001>
module attributes {stable_mosaic.version = 11 : i64} {
  func.func @_in_proj_kernel(%arg0: i32, %arg1: memref<16x32xbf16, #tpu.memory_space<vmem>>, %arg2: memref<32x256xbf16, #tpu.memory_space<vmem>>, %arg3: memref<1x256xf32, #tpu.memory_space<vmem>>, %arg4: memref<16x128xbf16, #tpu.memory_space<vmem>>, %arg5: memref<16x128xbf16, #tpu.memory_space<vmem>>) attributes {dimension_semantics = [#tpu.dimension_semantics<parallel>], iteration_bounds = array<i64: 1>, scalar_prefetch = 0 : i64, scratch_operands = 0 : i64, tpu.core_type = #tpu.core_type<tc>, window_params = [{transform_indices = @transform_0, window_bounds = array<i64: 16, 32>}, {pipeline_mode = #tpu.pipeline_mode<synchronous>, transform_indices = @transform_1, window_bounds = array<i64: 32, 256>}, {pipeline_mode = #tpu.pipeline_mode<synchronous>, transform_indices = @transform_2, window_bounds = array<i64: 1, 256>}, {transform_indices = @transform_3, window_bounds = array<i64: 16, 128>}, {transform_indices = @transform_4, window_bounds = array<i64: 16, 128>}]} {
    %c0 = arith.constant 0 : index
    %c0_0 = arith.constant 0 : index
    %0 = vector.load %arg1[%c0, %c0_0] : memref<16x32xbf16, #tpu.memory_space<vmem>>, vector<16x32xbf16>
    %c0_1 = arith.constant 0 : index
    %c0_2 = arith.constant 0 : index
    %1 = vector.load %arg2[%c0_1, %c0_2] : memref<32x256xbf16, #tpu.memory_space<vmem>>, vector<32x256xbf16>
    %cst = arith.constant dense<0.000000e+00> : vector<16x256xf32>
    %2 = tpu.matmul %0, %1, %cst {dimension_numbers = #tpu.dot_dimension_numbers<[1], [0], [0], [1], [0, 0, 1, 1], [], []>} : vector<16x32xbf16>, vector<32x256xbf16>, vector<16x256xf32> -> vector<16x256xf32>
    %c0_3 = arith.constant 0 : index
    %c0_4 = arith.constant 0 : index
    %3 = vector.load %arg3[%c0_3, %c0_4] : memref<1x256xf32, #tpu.memory_space<vmem>>, vector<1x256xf32>
    %4 = vector.broadcast %3 : vector<1x256xf32> to vector<16x256xf32>
    %5 = arith.addf %2, %4 : vector<16x256xf32>
    %6 = vector.extract_strided_slice %5 {offsets = [0, 0], sizes = [16, 128], strides = [1, 1]} : vector<16x256xf32> to vector<16x128xf32>
    %7 = arith.truncf %6 : vector<16x128xf32> to vector<16x128xbf16>
    %c0_5 = arith.constant 0 : index
    %c0_6 = arith.constant 0 : index
    %8 = vector.load %arg4[%c0_5, %c0_6] : memref<16x128xbf16, #tpu.memory_space<vmem>>, vector<16x128xbf16>
    tpu.vector_store %arg4[%c0_5, %c0_6], %7 {strides = array<i32>} : memref<16x128xbf16, #tpu.memory_space<vmem>>, vector<16x128xbf16>,
    %9 = vector.extract_strided_slice %5 {offsets = [0, 128], sizes = [16, 128], strides = [1, 1]} : vector<16x256xf32> to vector<16x128xf32>
    %10 = arith.truncf %9 : vector<16x128xf32> to vector<16x128xbf16>
    %c0_7 = arith.constant 0 : index
    %c0_8 = arith.constant 0 : index
    %11 = vector.load %arg5[%c0_7, %c0_8] : memref<16x128xbf16, #tpu.memory_space<vmem>>, vector<16x128xbf16>
    tpu.vector_store %arg5[%c0_7, %c0_8], %10 {strides = array<i32>} : memref<16x128xbf16, #tpu.memory_space<vmem>>, vector<16x128xbf16>,
    return
  }
  func.func @transform_0(%arg0: i32) -> (i32, i32) {
    %c0_i32 = arith.constant 0 : i32
    %c0_i32_0 = arith.constant 0 : i32
    return %arg0, %c0_i32 : i32, i32
  }
  func.func @transform_1(%arg0: i32) -> (i32, i32) {
    %c0_i32 = arith.constant 0 : i32
    %c0_i32_0 = arith.constant 0 : i32
    %c0_i32_1 = arith.constant 0 : i32
    return %c0_i32, %c0_i32_0 : i32, i32
  }
  func.func @transform_2(%arg0: i32) -> (i32, i32) {
    %c0_i32 = arith.constant 0 : i32
    %c0_i32_0 = arith.constant 0 : i32
    %c0_i32_1 = arith.constant 0 : i32
    return %c0_i32, %c0_i32_0 : i32, i32
  }
  func.func @transform_3(%arg0: i32) -> (i32, i32) {
    %c0_i32 = arith.constant 0 : i32
    %c0_i32_0 = arith.constant 0 : i32
    return %arg0, %c0_i32 : i32, i32
  }
  func.func @transform_4(%arg0: i32) -> (i32, i32) {
    %c0_i32 = arith.constant 0 : i32
    %c0_i32_0 = arith.constant 0 : i32
    return %arg0, %c0_i32 : i32, i32
  }
}

module attributes {stable_mosaic.version = 11 : i64} {
  func.func @_in_proj_kernel(%arg0: i32, %arg1: memref<16x32xbf16, #tpu.memory_space<vmem>>, %arg2: memref<32x256xbf16, #tpu.memory_space<vmem>>, %arg3: memref<1x256xf32, #tpu.memory_space<vmem>>, %arg4: memref<16x128xbf16, #tpu.memory_space<vmem>>, %arg5: memref<16x128xbf16, #tpu.memory_space<vmem>>) attributes {dimension_semantics = [#tpu.dimension_semantics<parallel>], iteration_bounds = array<i64: 1>, scalar_prefetch = 0 : i64, scratch_operands = 0 : i64, tpu.core_type = #tpu.core_type<tc>, window_params = [{transform_indices = @transform_0, window_bounds = array<i64: 16, 32>}, {pipeline_mode = #tpu.pipeline_mode<synchronous>, transform_indices = @transform_1, window_bounds = array<i64: 32, 256>}, {pipeline_mode = #tpu.pipeline_mode<synchronous>, transform_indices = @transform_2, window_bounds = array<i64: 1, 256>}, {transform_indices = @transform_3, window_bounds = array<i64: 16, 128>}, {transform_indices = @transform_4, window_bounds = array<i64: 16, 128>}]} {
    %c0 = arith.constant 0 : index
    %c0_0 = arith.constant 0 : index
    %0 = vector.load %arg1[%c0, %c0_0] : memref<16x32xbf16, #tpu.memory_space<vmem>>, vector<16x32xbf16>
    %c0_1 = arith.constant 0 : index
    %c0_2 = arith.constant 0 : index
    %1 = vector.load %arg2[%c0_1, %c0_2] : memref<32x256xbf16, #tpu.memory_space<vmem>>, vector<32x256xbf16>
    %cst = arith.constant dense<0.000000e+00> : vector<16x256xf32>
    %2 = tpu.matmul %0, %1, %cst {dimension_numbers = #tpu.dot_dimension_numbers<[1], [0], [0], [1], [0, 0, 1, 1], [], []>} : vector<16x32xbf16>, vector<32x256xbf16>, vector<16x256xf32> -> vector<16x256xf32>
    %c0_3 = arith.constant 0 : index
    %c0_4 = arith.constant 0 : index
    %3 = vector.load %arg3[%c0_3, %c0_4] : memref<1x256xf32, #tpu.memory_space<vmem>>, vector<1x256xf32>
    %4 = vector.broadcast %3 : vector<1x256xf32> to vector<16x256xf32>
    %5 = arith.addf %2, %4 : vector<16x256xf32>
    %6 = vector.extract_strided_slice %5 {offsets = [0, 0], sizes = [16, 128], strides = [1, 1]} : vector<16x256xf32> to vector<16x128xf32>
    %7 = arith.truncf %6 : vector<16x128xf32> to vector<16x128xbf16>
    %c0_5 = arith.constant 0 : index
    %c0_6 = arith.constant 0 : index
    %8 = vector.load %arg4[%c0_5, %c0_6] : memref<16x128xbf16, #tpu.memory_space<vmem>>, vector<16x128xbf16>
    tpu.vector_store %arg4[%c0_5, %c0_6], %7 {strides = array<i32>} : memref<16x128xbf16, #tpu.memory_space<vmem>>, vector<16x128xbf16>,
    %9 = vector.extract_strided_slice %5 {offsets = [0, 128], sizes = [16, 128], strides = [1, 1]} : vector<16x256xf32> to vector<16x128xf32>
    %10 = arith.truncf %9 : vector<16x128xf32> to vector<16x128xbf16>
    %c0_7 = arith.constant 0 : index
    %c0_8 = arith.constant 0 : index
    %11 = vector.load %arg5[%c0_7, %c0_8] : memref<16x128xbf16, #tpu.memory_space<vmem>>, vector<16x128xbf16>
    tpu.vector_store %arg5[%c0_7, %c0_8], %10 {strides = array<i32>} : memref<16x128xbf16, #tpu.memory_space<vmem>>, vector<16x128xbf16>,
    return
  }
  func.func @transform_0(%arg0: i32) -> (i32, i32) {
    %c0_i32 = arith.constant 0 : i32
    %c0_i32_0 = arith.constant 0 : i32
    return %arg0, %c0_i32 : i32, i32
  }
  func.func @transform_1(%arg0: i32) -> (i32, i32) {
    %c0_i32 = arith.constant 0 : i32
    %c0_i32_0 = arith.constant 0 : i32
    %c0_i32_1 = arith.constant 0 : i32
    return %c0_i32, %c0_i32_0 : i32, i32
  }
  func.func @transform_2(%arg0: i32) -> (i32, i32) {
    %c0_i32 = arith.constant 0 : i32
    %c0_i32_0 = arith.constant 0 : i32
    %c0_i32_1 = arith.constant 0 : i32
    return %c0_i32, %c0_i32_0 : i32, i32
  }
  func.func @transform_3(%arg0: i32) -> (i32, i32) {
    %c0_i32 = arith.constant 0 : i32
    %c0_i32_0 = arith.constant 0 : i32
    return %arg0, %c0_i32 : i32, i32
  }
  func.func @transform_4(%arg0: i32) -> (i32, i32) {
    %c0_i32 = arith.constant 0 : i32
    %c0_i32_0 = arith.constant 0 : i32
    return %arg0, %c0_i32 : i32, i32
  }
}

</mosaic_0001>

<bundles_post_ra>
// kernel: tpu_custom_call.1
= control target key start
LH: loop header
LB: loop body
LE: loop exit
PB: predicated region body
PF: predicated region fallthrough
CT: control target
= control target key end

     0   :  { %10 = vsyncpa [#allocation3], 0  ;;  %s428_s0 = inlined_call_operand.hbm [shape: bf16[16,32], index: 0, kind: input, shape index: {}]   ;;  %s429_s1 = inlined_call_operand.hbm [shape: bf16[32,256], index: 1, kind: input, shape index: {}]   ;;  %s430_s2 = inlined_call_operand.vmem [shape: f32[1,256], index: 2, kind: input, shape index: {}]   ;;  %s431_s3 = inlined_call_operand.hbm [shape: bf16[16,128], index: 3, kind: output, shape index: {0}]   ;;  %s432_s4 = inlined_call_operand.hbm [shape: bf16[16,128], index: 4, kind: output, shape index: {1}]  }
   0x1   :  { %11 = vsyncpa [#allocation6], 0 }
   0x2   :  { %12 = vsyncpa [#allocation4], 0 }
   0x3   :  { %13 = vsyncpa [#allocation9], 0  ;;  %s327_s15 = smov [#allocation2]   ;;  %s231_s19 = scalar_lea.hbm %s428_s0, 128 }
   0x4   :  { %s19_s16 = sshll.u32 %s327_s15, 4  ;;  %p232_p0 = scmp.ne.s32.totalorder %s428_s0, %s231_s19  ;;  %s20_s16 = int_to_ptr.vmem [resolvable:$true] %s19_s16 }
   0x5   :  { %p235_p1 = scmp.lt.u32.totalorder %s231_s19, %s428_s0 }
   0x7   :  { %p237_p2 = pnand %p235_p1, %p232_p0 }
   0x9   :  { %240 = shalt.err (!%p237_p2)
}
   0xa   :  { %s241_s24 = scalar_lea.vmem %s20_s16, 128  ;;  %p246_p4 = scmp.lt.s32.totalorder %s20_s16, %s20_s16 }
   0xb   :  { %p242_p3 = scmp.ne.s32.totalorder %s20_s16, %s241_s24  ;;  %p247_p5 = scmp.lt.s32.totalorder %s241_s24, %s241_s24 }
   0xd   :  { %p248_p6 = por %p247_p5, %p246_p4 }
   0xf   :  { %p249_p7 = pnand %p248_p6, %p242_p3 }
  0x11   :  { %252 = shalt.err (!%p249_p7)
}
  0x12   :  { %s328_s25 = smov 64   ;;  %s329_s26 = smov 4  }
  0x13   :  { %25 = dma.hbm_to_vmem [thread:$0]  %s428_s0, 128, %s20_s16, [#allocation3], %s328_s25, %s328_s25, %s329_s26  }
  0x14   :  { %s330_s29 = smov [#allocation5]   ;;  %s253_s7 = scalar_lea.hbm %s429_s1, 512 }
  0x15   :  { %s31_s30 = sshll.u32 %s330_s29, 4  ;;  %p254_p8 = scmp.ne.s32.totalorder %s429_s1, %s253_s7  ;;  %s32_s30 = int_to_ptr.vmem [resolvable:$true] %s31_s30 }
  0x16   :  { %p257_p9 = scmp.lt.u32.totalorder %s253_s7, %s429_s1 }
  0x18   :  { %p259_p10 = pnand %p257_p9, %p254_p8 }
  0x1a   :  { %262 = shalt.err (!%p259_p10)
}
  0x1b   :  { %s263_s12 = scalar_lea.vmem %s32_s30, 512  ;;  %p268_p12 = scmp.lt.s32.totalorder %s32_s30, %s32_s30 }
  0x1c   :  { %p264_p11 = scmp.ne.s32.totalorder %s32_s30, %s263_s12  ;;  %p269_p13 = scmp.lt.s32.totalorder %s263_s12, %s263_s12 }
  0x1e   :  { %p270_p0 = por %p269_p13, %p268_p12 }
  0x20   :  { %p271_p1 = pnand %p270_p0, %p264_p11 }
  0x22   :  { %274 = shalt.err (!%p271_p1)
}
  0x23   :  { %s331_s0 = smov 128   ;;  %s332_s13 = smov 8  }
  0x24   :  { %37 = dma.hbm_to_vmem [thread:$0]  %s429_s1, 512, %s32_s30, [#allocation6], %s331_s0, %s331_s0, %s332_s13  }
  0x25   :  { %319 = dma.done.wait [#allocation3], 128  }
  0x26   :  { %320 = vsyncadd [#allocation3], 4294967168 }
  0x27   :  { %321 = dma.done.wait [#allocation6], 512  }
  0x28   :  { %322 = vsyncadd [#allocation6], 4294966784  ;;  %v333_v0 = vmov 0   ;;  %v224_v1 = vld [vmem:[#allocation5 + $0x4] ss:$8 sps:$4 sm:$0xff]   ;;  %v230_v5 = vld [vmem:[#allocation2] sm:$0xff]   ;;  %v55_v6 = vlaneseq }
  0x29   :  { %126 = vmatprep.mubr.bf16.mxu0 %v333_v0  ;;  %v226_v2 = vld [vmem:[#allocation5] ss:$8 sps:$4 sm:$0xff]   ;;  %94 = vmatprep.subr.bf16.mxu0 %v224_v1  ;;  %v227_v3 = vld [vmem:[#allocation5 + $0x14] ss:$8 sps:$4 sm:$0xff]   ;;  %v229_v4 = vld [vmem:[#allocation5 + $0x10] ss:$8 sps:$4 sm:$0xff]  }
  0x2a   :  { %95 = vmatpush1.bf16.msra.mxu0 %v226_v2  ;;  %vm90_vm0 = vcmask 261120   ;;  %v56_v7 = vshrl.u32 %v55_v6, 7  ;;  %v53_v9 = vld [vmem:[%s430_s2] sm:$0x3]  ;;  %s334_s17 = smov [#allocation7]   ;;  %s335_s19 = smov [#allocation8]  }
  0x2b   :  { %96 = vmatprep.subr.bf16.mxu0 %v227_v3  ;;  %s162_s18 = sshll.u32 %s334_s17, 4  ;;  %s174_s20 = sshll.u32 %s335_s19, 4  ;;  %s163_s18 = int_to_ptr.vmem [resolvable:$true] %s162_s18  ;;  %s391_s20 = int_to_ptr.vmem [resolvable:$true] %s174_s20 }
  0x2c   :  { %v57_v8 = vsub.s32 0, %v56_v7  ;;  %v61_v10 = vsub.s32 1, %v56_v7  ;;  %s275_s2 = scalar_lea.vmem %s163_s18, 128  ;;  %p280_p3 = scmp.lt.s32.totalorder %s163_s18, %s163_s18 }
  0x2d   :  { %p276_p2 = scmp.ne.s32.totalorder %s163_s18, %s275_s2  ;;  %p281_p4 = scmp.lt.s32.totalorder %s275_s2, %s275_s2 }
  0x2e   :  { %97 = vmatpush1.bf16.msra.mxu0 %v229_v4  ;;  %v58_v11 = vrot.slane %v53_v9, %v57_v8  ;;  %v62_v13 = vrot.slane %v53_v9, %v61_v10 }
  0x2f   :  { %p282_p5 = por %p281_p4, %p280_p3 }
  0x31   :  { %196 = vmatmul.mubr.msk.bf16.vlgmr.msra.gmra.mrb[0].mxu0 %vm90_vm0, %v230_v5  ;;  %p283_p6 = pnand %p282_p5, %p276_p2 }
 0x104   :  { %v128_v12 = vpop.f32.mrb[0].mxu0 }
 0x105   :  { %v130_v14 = vpop.f32.mrb[1].mxu0  ;;  %v129_v16 = vadd.f32 %v128_v12, %v58_v11 }
 0x106   :  { %v132_v15 = vpop.f32.mrb[2].mxu0  ;;  %v131_v19 = vadd.f32 %v130_v14, %v62_v13 }
 0x107   :  { %v133_v17 = vadd.f32 %v132_v15, %v58_v11  ;;  %v134_v18 = vpop.f32.mrb[3].mxu0 }
 0x108   :  { %v135_v20 = vadd.f32 %v134_v18, %v62_v13 }
 0x109   :  { %v208_v21 = vpack.c.bf16 %v133_v17, %v129_v16 }
 0x10a   :  { %v213_v22 = vpack.c.bf16 %v135_v20, %v131_v19 }
 0x10b   :  { %209 = vst [vmem:[#allocation7] sm:$0xff] %v208_v21  }
 0x10c   :  { %214 = vst [vmem:[#allocation8] sm:$0xff] %v213_v22  }
 0x10d   :  { %286 = shalt.err (!%p283_p6)
}
 0x10e   :  { %s287_s23 = scalar_lea.hbm %s431_s3, 128 }
 0x10f   :  { %p288_p7 = scmp.ne.s32.totalorder %s431_s3, %s287_s23  ;;  %p291_p8 = scmp.lt.u32.totalorder %s287_s23, %s431_s3 }
 0x111   :  { %p293_p9 = pnand %p291_p8, %p288_p7 }
 0x113   :  { %296 = shalt.err (!%p293_p9)
}
 0x114   :  { %168 = dma.vmem_to_hbm [thread:$0]  %s163_s18, 128, %s431_s3, [#allocation4], %s328_s25, %s328_s25, %s329_s26  }
 0x115   :  { %s297_s6 = scalar_lea.vmem %s391_s20, 128  ;;  %p302_p11 = scmp.lt.s32.totalorder %s391_s20, %s391_s20 }
 0x116   :  { %p298_p10 = scmp.ne.s32.totalorder %s391_s20, %s297_s6  ;;  %p303_p12 = scmp.lt.s32.totalorder %s297_s6, %s297_s6 }
 0x118   :  { %p304_p13 = por %p303_p12, %p302_p11 }
 0x11a   :  { %p305_p0 = pnand %p304_p13, %p298_p10 }
 0x11c   :  { %308 = shalt.err (!%p305_p0)
}
 0x11d   :  { %s309_s9 = scalar_lea.hbm %s432_s4, 128 }
 0x11e   :  { %p310_p1 = scmp.ne.s32.totalorder %s432_s4, %s309_s9  ;;  %p313_p2 = scmp.lt.u32.totalorder %s309_s9, %s432_s4 }
 0x120   :  { %p315_p3 = pnand %p313_p2, %p310_p1 }
 0x122   :  { %318 = shalt.err (!%p315_p3)
}
 0x123   :  { %180 = dma.vmem_to_hbm [thread:$0]  %s391_s20, 128, %s432_s4, [#allocation9], %s328_s25, %s328_s25, %s329_s26  }
 0x124   :  { %323 = dma.done.wait [#allocation4], 128  }
 0x125   :  { %324 = vsyncadd [#allocation4], 4294967168 }
 0x126   :  { %325 = dma.done.wait [#allocation9], 128  }
 0x127   :  { %326 = vsyncadd [#allocation9], 4294967168 }
 0x128   :  { %187 = vsyncpa [#allocation3], 1 }
 0x129   :  { %188 = vsyncpa [#allocation6], 1 }
 0x12a   :  { %189 = vsyncpa [#allocation4], 1 }
 0x12b   :  { %190 = vsyncpa [#allocation9], 1 }

// kernel: tpu_custom_call.1
= control target key start
LH: loop header
LB: loop body
LE: loop exit
PB: predicated region body
PF: predicated region fallthrough
CT: control target
= control target key end

     0   :  { %10 = vsyncpa [#allocation3], 0  ;;  %s428_s0 = inlined_call_operand.hbm [shape: bf16[16,32], index: 0, kind: input, shape index: {}]   ;;  %s429_s1 = inlined_call_operand.hbm [shape: bf16[32,256], index: 1, kind: input, shape index: {}]   ;;  %s430_s2 = inlined_call_operand.vmem [shape: f32[1,256], index: 2, kind: input, shape index: {}]   ;;  %s431_s3 = inlined_call_operand.hbm [shape: bf16[16,128], index: 3, kind: output, shape index: {0}]   ;;  %s432_s4 = inlined_call_operand.hbm [shape: bf16[16,128], index: 4, kind: output, shape index: {1}]  }
   0x1   :  { %11 = vsyncpa [#allocation6], 0 }
   0x2   :  { %12 = vsyncpa [#allocation4], 0 }
   0x3   :  { %13 = vsyncpa [#allocation9], 0  ;;  %s327_s15 = smov [#allocation2]   ;;  %s231_s19 = scalar_lea.hbm %s428_s0, 128 }
   0x4   :  { %s19_s16 = sshll.u32 %s327_s15, 4  ;;  %p232_p0 = scmp.ne.s32.totalorder %s428_s0, %s231_s19  ;;  %s20_s16 = int_to_ptr.vmem [resolvable:$true] %s19_s16 }
   0x5   :  { %p235_p1 = scmp.lt.u32.totalorder %s231_s19, %s428_s0 }
   0x7   :  { %p237_p2 = pnand %p235_p1, %p232_p0 }
   0x9   :  { %240 = shalt.err (!%p237_p2)
}
   0xa   :  { %s241_s24 = scalar_lea.vmem %s20_s16, 128  ;;  %p246_p4 = scmp.lt.s32.totalorder %s20_s16, %s20_s16 }
   0xb   :  { %p242_p3 = scmp.ne.s32.totalorder %s20_s16, %s241_s24  ;;  %p247_p5 = scmp.lt.s32.totalorder %s241_s24, %s241_s24 }
   0xd   :  { %p248_p6 = por %p247_p5, %p246_p4 }
   0xf   :  { %p249_p7 = pnand %p248_p6, %p242_p3 }
  0x11   :  { %252 = shalt.err (!%p249_p7)
}
  0x12   :  { %s328_s25 = smov 64   ;;  %s329_s26 = smov 4  }
  0x13   :  { %25 = dma.hbm_to_vmem [thread:$0]  %s428_s0, 128, %s20_s16, [#allocation3], %s328_s25, %s328_s25, %s329_s26  }
  0x14   :  { %s330_s29 = smov [#allocation5]   ;;  %s253_s7 = scalar_lea.hbm %s429_s1, 512 }
  0x15   :  { %s31_s30 = sshll.u32 %s330_s29, 4  ;;  %p254_p8 = scmp.ne.s32.totalorder %s429_s1, %s253_s7  ;;  %s32_s30 = int_to_ptr.vmem [resolvable:$true] %s31_s30 }
  0x16   :  { %p257_p9 = scmp.lt.u32.totalorder %s253_s7, %s429_s1 }
  0x18   :  { %p259_p10 = pnand %p257_p9, %p254_p8 }
  0x1a   :  { %262 = shalt.err (!%p259_p10)
}
  0x1b   :  { %s263_s12 = scalar_lea.vmem %s32_s30, 512  ;;  %p268_p12 = scmp.lt.s32.totalorder %s32_s30, %s32_s30 }
  0x1c   :  { %p264_p11 = scmp.ne.s32.totalorder %s32_s30, %s263_s12  ;;  %p269_p13 = scmp.lt.s32.totalorder %s263_s12, %s263_s12 }
  0x1e   :  { %p270_p0 = por %p269_p13, %p268_p12 }
  0x20   :  { %p271_p1 = pnand %p270_p0, %p264_p11 }
  0x22   :  { %274 = shalt.err (!%p271_p1)
}
  0x23   :  { %s331_s0 = smov 128   ;;  %s332_s13 = smov 8  }
  0x24   :  { %37 = dma.hbm_to_vmem [thread:$0]  %s429_s1, 512, %s32_s30, [#allocation6], %s331_s0, %s331_s0, %s332_s13  }
  0x25   :  { %319 = dma.done.wait [#allocation3], 128  }
  0x26   :  { %320 = vsyncadd [#allocation3], 4294967168 }
  0x27   :  { %321 = dma.done.wait [#allocation6], 512  }
  0x28   :  { %322 = vsyncadd [#allocation6], 4294966784  ;;  %v333_v0 = vmov 0   ;;  %v224_v1 = vld [vmem:[#allocation5 + $0x4] ss:$8 sps:$4 sm:$0xff]   ;;  %v230_v5 = vld [vmem:[#allocation2] sm:$0xff]   ;;  %v55_v6 = vlaneseq }
  0x29   :  { %126 = vmatprep.mubr.bf16.mxu0 %v333_v0  ;;  %v226_v2 = vld [vmem:[#allocation5] ss:$8 sps:$4 sm:$0xff]   ;;  %94 = vmatprep.subr.bf16.mxu0 %v224_v1  ;;  %v227_v3 = vld [vmem:[#allocation5 + $0x14] ss:$8 sps:$4 sm:$0xff]   ;;  %v229_v4 = vld [vmem:[#allocation5 + $0x10] ss:$8 sps:$4 sm:$0xff]  }
  0x2a   :  { %95 = vmatpush1.bf16.msra.mxu0 %v226_v2  ;;  %vm90_vm0 = vcmask 261120   ;;  %v56_v7 = vshrl.u32 %v55_v6, 7  ;;  %v53_v9 = vld [vmem:[%s430_s2] sm:$0x3]  ;;  %s334_s17 = smov [#allocation7]   ;;  %s335_s19 = smov [#allocation8]  }
  0x2b   :  { %96 = vmatprep.subr.bf16.mxu0 %v227_v3  ;;  %s162_s18 = sshll.u32 %s334_s17, 4  ;;  %s174_s20 = sshll.u32 %s335_s19, 4  ;;  %s163_s18 = int_to_ptr.vmem [resolvable:$true] %s162_s18  ;;  %s391_s20 = int_to_ptr.vmem [resolvable:$true] %s174_s20 }
  0x2c   :  { %v57_v8 = vsub.s32 0, %v56_v7  ;;  %v61_v10 = vsub.s32 1, %v56_v7  ;;  %s275_s2 = scalar_lea.vmem %s163_s18, 128  ;;  %p280_p3 = scmp.lt.s32.totalorder %s163_s18, %s163_s18 }
  0x2d   :  { %p276_p2 = scmp.ne.s32.totalorder %s163_s18, %s275_s2  ;;  %p281_p4 = scmp.lt.s32.totalorder %s275_s2, %s275_s2 }
  0x2e   :  { %97 = vmatpush1.bf16.msra.mxu0 %v229_v4  ;;  %v58_v11 = vrot.slane %v53_v9, %v57_v8  ;;  %v62_v13 = vrot.slane %v53_v9, %v61_v10 }
  0x2f   :  { %p282_p5 = por %p281_p4, %p280_p3 }
  0x31   :  { %196 = vmatmul.mubr.msk.bf16.vlgmr.msra.gmra.mrb[0].mxu0 %vm90_vm0, %v230_v5  ;;  %p283_p6 = pnand %p282_p5, %p276_p2 }
 0x104   :  { %v128_v12 = vpop.f32.mrb[0].mxu0 }
 0x105   :  { %v130_v14 = vpop.f32.mrb[1].mxu0  ;;  %v129_v16 = vadd.f32 %v128_v12, %v58_v11 }
 0x106   :  { %v132_v15 = vpop.f32.mrb[2].mxu0  ;;  %v131_v19 = vadd.f32 %v130_v14, %v62_v13 }
 0x107   :  { %v133_v17 = vadd.f32 %v132_v15, %v58_v11  ;;  %v134_v18 = vpop.f32.mrb[3].mxu0 }
 0x108   :  { %v135_v20 = vadd.f32 %v134_v18, %v62_v13 }
 0x109   :  { %v208_v21 = vpack.c.bf16 %v133_v17, %v129_v16 }
 0x10a   :  { %v213_v22 = vpack.c.bf16 %v135_v20, %v131_v19 }
 0x10b   :  { %209 = vst [vmem:[#allocation7] sm:$0xff] %v208_v21  }
 0x10c   :  { %214 = vst [vmem:[#allocation8] sm:$0xff] %v213_v22  }
 0x10d   :  { %286 = shalt.err (!%p283_p6)
}
 0x10e   :  { %s287_s23 = scalar_lea.hbm %s431_s3, 128 }
 0x10f   :  { %p288_p7 = scmp.ne.s32.totalorder %s431_s3, %s287_s23  ;;  %p291_p8 = scmp.lt.u32.totalorder %s287_s23, %s431_s3 }
 0x111   :  { %p293_p9 = pnand %p291_p8, %p288_p7 }
 0x113   :  { %296 = shalt.err (!%p293_p9)
}
 0x114   :  { %168 = dma.vmem_to_hbm [thread:$0]  %s163_s18, 128, %s431_s3, [#allocation4], %s328_s25, %s328_s25, %s329_s26  }
 0x115   :  { %s297_s6 = scalar_lea.vmem %s391_s20, 128  ;;  %p302_p11 = scmp.lt.s32.totalorder %s391_s20, %s391_s20 }
 0x116   :  { %p298_p10 = scmp.ne.s32.totalorder %s391_s20, %s297_s6  ;;  %p303_p12 = scmp.lt.s32.totalorder %s297_s6, %s297_s6 }
 0x118   :  { %p304_p13 = por %p303_p12, %p302_p11 }
 0x11a   :  { %p305_p0 = pnand %p304_p13, %p298_p10 }
 0x11c   :  { %308 = shalt.err (!%p305_p0)
}
 0x11d   :  { %s309_s9 = scalar_lea.hbm %s432_s4, 128 }
 0x11e   :  { %p310_p1 = scmp.ne.s32.totalorder %s432_s4, %s309_s9  ;;  %p313_p2 = scmp.lt.u32.totalorder %s309_s9, %s432_s4 }
 0x120   :  { %p315_p3 = pnand %p313_p2, %p310_p1 }
 0x122   :  { %318 = shalt.err (!%p315_p3)
}
 0x123   :  { %180 = dma.vmem_to_hbm [thread:$0]  %s391_s20, 128, %s432_s4, [#allocation9], %s328_s25, %s328_s25, %s329_s26  }
 0x124   :  { %323 = dma.done.wait [#allocation4], 128  }
 0x125   :  { %324 = vsyncadd [#allocation4], 4294967168 }
 0x126   :  { %325 = dma.done.wait [#allocation9], 128  }
 0x127   :  { %326 = vsyncadd [#allocation9], 4294967168 }
 0x128   :  { %187 = vsyncpa [#allocation3], 1 }
 0x129   :  { %188 = vsyncpa [#allocation6], 1 }
 0x12a   :  { %189 = vsyncpa [#allocation4], 1 }
 0x12b   :  { %190 = vsyncpa [#allocation9], 1 }

</bundles_post_ra>
